<compile_context>
chip_gen: v5e
topology: v5e:2x2
jax: 0.10.0
libtpu: 0.0.40
codegen_flags: <defaults>
</compile_context>

<pallas_src>
import functools

import numpy as np
import jax
import jax.numpy as jnp
from jax import lax
from jax.experimental import pallas as pl
from jax.experimental.pallas import tpu as pltpu


def _round_up(x, m):
    return ((x + m - 1) // m) * m


def _pick_tile(dim, align, cap, max_waste=1.125):
    """Largest tile (multiple of `align`, <= cap) whose padding waste is small."""
    dim_aligned = _round_up(max(int(dim), 1), align)
    cap = min(cap, dim_aligned)
    best_t, best_pad = align, dim_aligned
    t = align
    while t <= cap:
        pad = _round_up(dim_aligned, t)
        if pad <= dim_aligned * max_waste and t >= best_t:
            best_t, best_pad = t, pad
        t += align
    return best_t, best_pad


def _band_matmul_kernel(x_ref, w_ref, o_ref, *, precision):
    """One (tm, tn) output tile; accumulate over the banded K axis directly in o_ref."""
    @pl.when(pl.program_id(2) == 0)
    def _init():
        o_ref[...] = jnp.zeros_like(o_ref)

    o_ref[...] += lax.dot_general(
        x_ref[...], w_ref[...],
        dimension_numbers=(((1,), (0,)), ((), ())),
        preferred_element_type=jnp.float32,
        precision=precision)


def laced_convolve(signal, response, lacing, *, compute_dtype=jnp.float32):
    """Laced convolution: phase gather / band weight in XLA, MACs on the MXU."""
    L = int(lacing)
    signal = jnp.asarray(signal, jnp.float32)
    response = jnp.asarray(response, jnp.float32)
    Pf, Ts = signal.shape
    Rf, Tr = response.shape
    Op = (Pf + Rf - 2) // L + 1          # coarse-pitch output length
    To = Ts + Tr - 1                     # full time-convolution length

    compute_dtype = jnp.dtype(compute_dtype)
    # f32 operands: request f32-grade MXU passes so the 1e-4 tolerance is guaranteed.
    # bf16 operands: default precision, f32 accumulation (preferred_element_type).
    precision = (lax.Precision.HIGHEST if compute_dtype == jnp.dtype(jnp.float32)
                 else lax.Precision.DEFAULT)

    # ---------------- tile selection (minimal padding, (8,128)-aligned) -------------
    tm, Mp = _pick_tile(Op, 8, 256)          # M tile (coarse pitch)
    tn, Np = _pick_tile(To, 128, 512)        # N tile (output time, lane axis)
    nM, nN = Mp // tm, Np // tn
    if nM * nN < 2 and tm > 8:               # v7x: give the 2nd TensorCore something to do
        tm = 8
        nM = Mp // tm

    # Banded reduction: per output-time tile only s in [t0-Tr+1, t0+tn) contributes.
    Kband = (tn + Tr - 1) * Rf
    base_kp = _round_up(Kband, 128)
    tk = 128                                  # always divides tn*Rf (tn % 128 == 0)
    for cand in (1024, 512, 256):
        if (tn * Rf) % cand == 0 and _round_up(Kband, cand) <= 1.125 * base_kp:
            tk = cand
            break
    Kband_p = _round_up(Kband, tk)
    nK = Kband_p // tk
    nkx = (tn * Rf) // tk                     # X K-block stride between output-time tiles
    Kxb = (nN - 1) * tn * Rf + Kband_p        # padded X reduction extent

    # ---------------- signal-phase matrix X (time-major K: k = s*Rf + j) ------------
    Ppad = (Rf - 1) + Op * L
    xpad = jnp.zeros((Ppad, Ts), jnp.float32).at[Rf - 1:Rf - 1 + Pf, :].set(signal)
    phases = [xpad[(Rf - 1 - j):(Rf - 1 - j) + (Op - 1) * L + 1:L, :]   # (Op, Ts)
              for j in range(Rf)]                                       # sig[k*L - j, s]
    X = jnp.stack(phases, axis=2).reshape(Op, Ts * Rf)   # X[k, s*Rf + j] = sig[k*L-j, s]

    # Zero-pad X along K by (Tr-1)*Rf in front so the per-tile window starts at j*tn*Rf.
    Xb = jnp.zeros((Mp, Kxb), compute_dtype)
    Xb = Xb.at[:Op, (Tr - 1) * Rf:(Tr - 1) * Rf + Ts * Rf].set(X.astype(compute_dtype))

    # ---------------- shared band weight block (independent of the N tile) ----------
    kk = jnp.arange(Kband_p)
    ds = kk // Rf                              # local signal-time offset within the band
    jj = kk % Rf                               # response pitch phase
    tt = jnp.arange(tn)
    u = tt[None, :] - ds[:, None] + (Tr - 1)   # response time index
    valid = (u >= 0) & (u < Tr)
    Wb = jnp.where(valid, response[jj[:, None], jnp.clip(u, 0, Tr - 1)], 0.0)
    Wb = Wb.astype(compute_dtype)              # (Kband_p, tn), zero outside the band

    # ---------------- pallas_call ----------------------------------------------------
    elt = compute_dtype.itemsize
    footprint = 2 * (tm * tk + tk * tn) * elt + 2 * tm * tn * 4
    vmem_limit = int(min(48 * 2**20, max(2 * footprint, 16 * 2**20)))

    cost = pl.CostEstimate(
        flops=2 * Mp * Np * Kband_p,
        transcendentals=0,
        # count the per-tile re-reads of X (per N tile) and W_band (per M*N tile)
        bytes_accessed=elt * (nN * Mp * Kband_p + nM * Np * Kband_p) + 4 * Mp * Np)

    out = pl.pallas_call(
        functools.partial(_band_matmul_kernel, precision=precision),
        out_shape=jax.ShapeDtypeStruct((Mp, Np), jnp.float32),
        grid_spec=pltpu.PrefetchScalarGridSpec(
            num_scalar_prefetch=0,
            grid=(nM, nN, nK),
            in_specs=[
                # X: banded window slides with the output-time tile j
                pl.BlockSpec((tm, tk), lambda i, j, k: (i, j * nkx + k)),
                # W_band: one block column, reused for every (i, j)
                pl.BlockSpec((tk, tn), lambda i, j, k: (k, 0)),
            ],
            out_specs=pl.BlockSpec((tm, tn), lambda i, j, k: (i, j)),
        ),
        compiler_params=pltpu.CompilerParams(
            dimension_semantics=("parallel", "parallel", "arbitrary"),
            vmem_limit_bytes=vmem_limit),
        cost_estimate=cost,
    )(Xb, Wb)

    return out[:Op, :To]


class LacedConvo:
    """JAX/Pallas equivalent of tred.graph.LacedConvo."""

    def __init__(self, lacing=None, taxis=-1):
        if lacing is None:
            raise ValueError('a unitless, integer N-tensor lacing is required')
        lac = np.asarray(lacing).reshape(-1)
        self._lacing_int = int(lac[0])              # Python int: no host sync at trace time
        self.lacing = jnp.asarray(lac, jnp.int32)   # buffer parity with the torch module
        self._taxis = taxis

    def __call__(self, signal, response, *, compute_dtype=jnp.float32):
        assert self._taxis in (-1, signal.ndim - 1)
        return laced_convolve(signal, response, self._lacing_int,
                              compute_dtype=compute_dtype)


def _reference(signal, response, L):
    """Pure numpy reference: full fine-grid conv, decimated by L along pitch."""
    Pf, Ts = signal.shape
    Rf, Tr = response.shape
    z = np.zeros((Pf + Rf - 1, Ts + Tr - 1), np.float64)
    for m in range(Pf):
        for j in range(Rf):
            z[m + j] += np.convolve(signal[m], response[j])
    return z[::L].astype(np.float32)


if __name__ == "__main__":
    key = jax.random.PRNGKey(0)
    k_sig, k_rsp = jax.random.split(key)

    lacing = 4
    signal = jax.random.normal(k_sig, (40, 32), dtype=jnp.float32)   # fine pitch x time
    response = jax.random.normal(k_rsp, (5, 8), dtype=jnp.float32)   # fine pitch x time

    node = LacedConvo(lacing=[lacing])

    # accurate path (f32 operands, HIGHEST-precision MXU passes)
    out = jax.block_until_ready(node(signal, response))
    ref = _reference(np.asarray(signal), np.asarray(response), lacing)
    assert out.shape == ref.shape, (out.shape, ref.shape)
    np.testing.assert_allclose(np.asarray(out), ref, rtol=1e-4, atol=1e-4)

    # bf16-operand / f32-accumulate fast path (looser tolerance, same structure)
    out_bf16 = jax.block_until_ready(
        node(signal, response, compute_dtype=jnp.bfloat16))
    np.testing.assert_allclose(np.asarray(out_bf16), ref, rtol=5e-2, atol=5e-1)

    print("KERNEL_OK")
</pallas_src>

<mosaic_0001>
module attributes {stable_mosaic.version = 11 : i64} {
  func.func @_band_matmul_kernel(%arg0: i32, %arg1: i32, %arg2: i32, %arg3: memref<8x128xf32, #tpu.memory_space<vmem>>, %arg4: memref<128x128xf32, #tpu.memory_space<vmem>>, %arg5: memref<8x128xf32, #tpu.memory_space<vmem>>) attributes {dimension_semantics = [#tpu.dimension_semantics<parallel>, #tpu.dimension_semantics<parallel>, #tpu.dimension_semantics<arbitrary>], iteration_bounds = array<i64: 2, 1, 6>, scalar_prefetch = 0 : i64, scratch_operands = 0 : i64, tpu.core_type = #tpu.core_type<tc>, window_params = [{transform_indices = @transform_0, window_bounds = array<i64: 8, 128>}, {transform_indices = @transform_1, window_bounds = array<i64: 128, 128>}, {transform_indices = @transform_2, window_bounds = array<i64: 8, 128>}]} {
    %c0_i32 = arith.constant 0 : i32
    %0 = arith.cmpi eq, %arg2, %c0_i32 : i32
    %1 = arith.extui %0 : i1 to i32
    %c0_i32_0 = arith.constant 0 : i32
    %2 = arith.cmpi ne, %1, %c0_i32_0 : i32
    scf.if %2 {
      %cst_8 = arith.constant 0.000000e+00 : f32
      %9 = vector.broadcast %cst_8 : f32 to vector<8x128xf32>
      %c0_9 = arith.constant 0 : index
      %c0_10 = arith.constant 0 : index
      %10 = vector.load %arg5[%c0_9, %c0_10] : memref<8x128xf32, #tpu.memory_space<vmem>>, vector<8x128xf32>
      tpu.vector_store %arg5[%c0_9, %c0_10], %9 {strides = array<i32>} : memref<8x128xf32, #tpu.memory_space<vmem>>, vector<8x128xf32>,
    } else {
    }
    %c0 = arith.constant 0 : index
    %c0_1 = arith.constant 0 : index
    %3 = vector.load %arg5[%c0, %c0_1] : memref<8x128xf32, #tpu.memory_space<vmem>>, vector<8x128xf32>
    %c0_2 = arith.constant 0 : index
    %c0_3 = arith.constant 0 : index
    %4 = vector.load %arg3[%c0_2, %c0_3] : memref<8x128xf32, #tpu.memory_space<vmem>>, vector<8x128xf32>
    %c0_4 = arith.constant 0 : index
    %c0_5 = arith.constant 0 : index
    %5 = vector.load %arg4[%c0_4, %c0_5] : memref<128x128xf32, #tpu.memory_space<vmem>>, vector<128x128xf32>
    %cst = arith.constant dense<0.000000e+00> : vector<8x128xf32>
    %6 = tpu.matmul %4, %5, %cst {dimension_numbers = #tpu.dot_dimension_numbers<[1], [0], [0], [1], [0, 0, 1, 1], [], []>, precision = #tpu.contract_precision<fp32>} : vector<8x128xf32>, vector<128x128xf32>, vector<8x128xf32> -> vector<8x128xf32>
    %7 = arith.addf %3, %6 : vector<8x128xf32>
    %c0_6 = arith.constant 0 : index
    %c0_7 = arith.constant 0 : index
    %8 = vector.load %arg5[%c0_6, %c0_7] : memref<8x128xf32, #tpu.memory_space<vmem>>, vector<8x128xf32>
    tpu.vector_store %arg5[%c0_6, %c0_7], %7 {strides = array<i32>} : memref<8x128xf32, #tpu.memory_space<vmem>>, vector<8x128xf32>,
    return
  }
  func.func @transform_0(%arg0: i32, %arg1: i32, %arg2: i32) -> (i32, i32) {
    %c5_i32 = arith.constant 5 : i32
    %0 = arith.muli %arg1, %c5_i32 : i32
    %1 = arith.addi %0, %arg2 : i32
    %c0_i32 = arith.constant 0 : i32
    return %arg0, %1 : i32, i32
  }
  func.func @transform_1(%arg0: i32, %arg1: i32, %arg2: i32) -> (i32, i32) {
    %c0_i32 = arith.constant 0 : i32
    %c0_i32_0 = arith.constant 0 : i32
    return %arg2, %c0_i32 : i32, i32
  }
  func.func @transform_2(%arg0: i32, %arg1: i32, %arg2: i32) -> (i32, i32) {
    %c0_i32 = arith.constant 0 : i32
    return %arg0, %arg1 : i32, i32
  }
}

</mosaic_0001>

<bundles_post_ra>
// kernel: tpu_custom_call.1
= control target key start
LH: loop header
LB: loop body
LE: loop exit
PB: predicated region body
PF: predicated region fallthrough
CT: control target
= control target key end

     0   :  { %s1636_s0 = inlined_call_operand.hbm [shape: f32[16,768], index: 0, kind: input, shape index: {}]   ;;  %s1637_s1 = inlined_call_operand.hbm [shape: f32[768,128], index: 1, kind: input, shape index: {}]   ;;  %s1638_s2 = inlined_call_operand.hbm [shape: f32[16,128], index: 2, kind: output, shape index: {}]  }
   0x1   :  { %1645 = sst [smem:[#allocation20_spill]] %s1636_s0 }
   0x2   :  { %7 = vsyncpa [#allocation3], 0 }
   0x3   :  { %9 = vsyncpa [#allocation3 + $0x1], 0 }
   0x4   :  { %10 = vsyncpa [#allocation6], 0 }
   0x5   :  { %12 = vsyncpa [#allocation6 + $0x1], 0 }
   0x6   :  { %13 = vsyncpa [#allocation4], 0 }
   0x7   :  { %15 = vsyncpa [#allocation4 + $0x1], 0  ;;  %s1116_s9 = smov 0   ;;  %s1118_s10 = smov 0  }
   0x8   :  { %s1120_s11 = smov 0   ;;  %s1122_s12 = smov 0  }
   0x9   :  { %s1124_s13 = smov 0   ;;  %s1126_s14 = smov 0  }
   0xa   :  { %s1128_s15 = smov 0   ;;  %s1130_s16 = smov 0  }
   0xb   :  { %s1132_s17 = smov 0   ;;  %s1134_s18 = smov 0  }
   0xc   :  { %s1136_s19 = smov 0   ;;  %s1138_s20 = smov 0  }
   0xd   :  { %s1140_s21 = smov 0   ;;  %s1142_s22 = smov 0  }
   0xe LB: > { %1646 = sst [smem:[#allocation11_spill]] %s1052_s11  ;;  %s732_s23 = sadd.s32 4294967295, %s1096_s22   ;;  %s1096_s22 = sphi %s1142_s22, %s21_s22   ;;  %s1092_s21 = sphi %s1140_s21, %s1684_s21   ;;  %s1088_s20 = sphi %s1138_s20, %s1683_s20   ;;  %s1084_s19 = sphi %s1136_s19, %s1672_s19   ;;  %s1080_s18 = sphi %s1134_s18, %s1682_s18   ;;  %s1076_s17 = sphi %s1132_s17, %s1671_s17   ;;  %s1072_s16 = sphi %s1130_s16, %s1681_s16   ;;  %s1068_s15 = sphi %s1128_s15, %s1680_s15   ;;  %s1064_s14 = sphi %s1126_s14, %s1679_s14   ;;  %s1060_s13 = sphi %s1124_s13, %s1678_s13   ;;  %s1056_s12 = sphi %s1122_s12, %s1677_s12   ;;  %s1052_s11 = sphi %s1120_s11, %s1668_s11   ;;  %s1048_s10 = sphi %s1118_s10, %s1676_s10   ;;  %s1044_s9 = sphi %s1116_s9, %s1675_s9  }
   0xf   : > { %1647 = sst [smem:[#allocation12_spill]] %s1076_s17  ;;  %s33_s25 = sadd.s32 1, %s1088_s20 }
  0x10   : > { %1648 = sst [smem:[#allocation13_spill]] %s1092_s21  ;;  %s40_s26 = sadd.s32 1, %s1092_s21 }
  0x11   : > { %p34_p0 = scmp.ge.s32.totalorder %s33_s25, 6  ;;  %s53_s27 = sadd.s32 1, %s1076_s17 }
  0x12   : > { %p60_p1 = scmp.ne.s32.totalorder %s1076_s17, %s1072_s16  ;;  %p61_p2 = scmp.eq.s32.totalorder %s1096_s22, 0 }
  0x13   : > { %s1686_s25 = smov (%p34_p0, %s33_s25), 0  ;;  %s1688_s26 = smov (!%p34_p0, %s40_s26), %s1092_s21 }
  0x14   : > { %1649 = sst [smem:[#allocation14_spill]] %s1686_s25  ;;  %s49_s28 = ssub.s32 %s1088_s20, %s1686_s25 }
  0x15   : > { %p1199_p3 = por %p61_p2, %p60_p1  ;;  %p42_p4 = scmp.ge.s32.totalorder %s1688_s26, 2 }
  0x16   : > { %p66_p5 = scmp.ne.s32.totalorder %s1072_s16, %s1068_s15  ;;  %p1206_p6 = scmp.eq.s32.totalorder %s732_s23, 0 }
  0x17   : > { %p77_p7 = scmp.eq.s32.totalorder %s49_s28, 0  ;;  %s1690_s26 = smov (%p42_p4, %s1688_s26), 0 }
  0x18   : > { %1652 = sst [smem:[#allocation15_spill]] %s1690_s26  ;;  %p1214_p8 = por %p1206_p6, %p66_p5 }
  0x19   : > { %s79_s4 = sadd.s32 1, %s1064_s14  ;;  %s48_s5 = ssub.s32 %s1092_s21, %s1690_s26 }
  0x1a   : > { %p86_p9 = scmp.ne.s32.totalorder %s1064_s14, %s1060_s13  ;;  %s50_s6 = sor.u32 %s49_s28, %s48_s5 }
  0x1b   : > { %p92_p10 = scmp.ne.s32.totalorder %s1060_s13, %s1056_s12  ;;  %p51_p11 = scmp.eq.s32.totalorder %s50_s6, 0 }
  0x1c   : > { %p1227_p12 = por %p86_p9, %p61_p2  ;;  %p105_p0 = scmp.eq.s32.totalorder %s48_s5, 0 }
  0x1d   : > { %s1232_s8 = scalar_select %p77_p7, %s1064_s14, %s79_s4  }
  0x1e   : > { %s1235_s15 = scalar_select %p51_p11, %s1076_s17, %s53_s27  }
  0x1f   : > { %1655 = sst [smem:[#allocation16_spill]] %s1232_s8  ;;  %p1239_p13 = por %p92_p10, %p1206_p6 }
  0x20   : > { %1656 = sst [smem:[#allocation17_spill]] %s1235_s15  ;;  %s107_s12 = sadd.s32 1, %s1052_s11 }
  0x21   : > { %p117_p1 = scmp.ne.s32.totalorder %s1052_s11, %s1048_s10  ;;  %p118_p2 = scmp.eq.s32.totalorder %s732_s23, 11 }
  0x22   : > { %s1247_s28 = scalar_select %p105_p0, %s1052_s11, %s107_s12  }
  0x23   : > { %p123_p4 = scmp.ne.s32.totalorder %s1048_s10, %s1044_s9  ;;  %s1659_s4 = sadd.s32 4294967294, %s1096_s22  }
  0x24   : > { %1658 = sst [smem:[#allocation18_spill]] %s1247_s28  ;;  %p124_p5 = scmp.eq.s32.totalorder %s1659_s4, 11 }
  0x25   : > { %p1255_p7 = por %p118_p2, %p117_p1  ;;  %p769_p6 = scmp.lt.s32.totalorder %s1096_s22, 12 }
  0x26   : > { %p1260_p9 = por %p124_p5, %p123_p4  ;;  %s144_s5 = sand.u32 1, %s1076_s17  }
  0x27   : > { %s736_s6 = sshll.u32 %s144_s5, 3  ;;  %s751_s12 = smul.u32 6, %s1092_s21 }
  0x28   : > { %s1661_s30 = scalar_select %p1260_p9, 1, 0 }
  0x29   : > { %s148_s23 = scalar_lea.vmem [#allocation2], %s736_s6  ;;  %p759_p10 = pnand %p769_p6, %p1199_p3 }
  0x2a   : > { %1662 = sst [smem:[#allocation19_spill]] %s1661_s30  ;;  %s160_s26 = sshll.u32 %s148_s23, 4  ;;  %s161_s26 = int_to_ptr.vmem [resolvable:$true] %s160_s26 }
  0x2b   : > { %s154_s4 = sadd.s32 %s1088_s20, %s751_s12  ;;  %s1663_s0 = sld [smem:[#allocation20_spill]] }
  0x2c   : > { %s737_s25 = sshll.u32 %s154_s4, 3  ;;  %p1274_p11 = pnand %p769_p6, %p1227_p12 }
  0x2d   : > { %p741_p0 = scmp.ge.s32.totalorder %s1096_s22, 1  ;;  %s145_s6 = scalar_lea.sflag [#allocation3], %s144_s5 }
  0x2e   : > { %p187_p1 = scmp.lt.s32.totalorder %s1096_s22, 13  ;;  %s167_s29 = sand.u32 1, %s1064_s14  }
  0x2f   : > { %s738_s12 = sshll.u32 %s167_s29, 7  ;;  %s750_s23 = sshll.u32 %s1088_s20, 7 }
  0x30   : > { %p188_p3 = pnand %p741_p0, %p187_p1  ;;  %s171_s4 = scalar_lea.vmem [#allocation5], %s738_s12 }
  0x31   : > { %s156_s28 = scalar_lea.hbm %s1663_s0, %s737_s25  ;;  %s179_s21 = sshll.u32 %s171_s4, 4  ;;  %s180_s21 = int_to_ptr.vmem [resolvable:$true] %s179_s21 }
  0x32   : > { %s158_s17 = sshll.u32 %s156_s28, 4  ;;  %s176_s7 = scalar_lea.hbm %s1637_s1, %s750_s23  ;;  %s159_s17 = int_to_ptr.hbm [resolvable:$true] %s158_s17 }
  0x33   : > { %761 = dma.hbm_to_vmem [thread:$0]  (!%p759_p10), %s159_s17, 128, %s161_s26, %s145_s6  }
  0x34   : > { %s177_s15 = sshll.u32 %s176_s7, 4  ;;  %s168_s28 = scalar_lea.sflag [#allocation6], %s167_s29  ;;  %s178_s15 = int_to_ptr.hbm [resolvable:$true] %s177_s15 }
  0x35   : > { %s1098_s0 = smov 128   ;;  %s1099_s30 = smov 8  }
  0x36   : > { %764 = dma.hbm_to_vmem [thread:$0]  (!%p1274_p11), %s178_s15, 2048, %s180_s21, %s168_s28, %s1098_s0, %s1098_s0, %s1099_s30  }
  0x37   : > { %191 = sbr.rel (%p188_p3) target bundleno = 281 (0x119), region = 28  ;;  %s193_s17 = sand.u32 (!%p188_p3), 1, %s1072_s16  }
  0x38   : > { %s1288_s26 = sshll.u32 (!%p188_p3), %s193_s17, 3  ;;  %s194_s5 = scalar_lea.sflag (!%p188_p3), [#allocation3], %s193_s17 }
  0x39   : > { %s197_s6 = scalar_lea.vmem (!%p188_p3), [#allocation2], %s1288_s26 }
  0x3c   : > { %1031 = dma.done.wait (%p1214_p8), %s194_s5, 128  }
  0x3d   : > { %1033 = vsyncadd (%p1214_p8), %s194_s5, 4294967168  ;;  %s203_s29 = sand.u32 1, %s1060_s13  }
  0x3e   : > { %s743_s12 = sshll.u32 %s203_s29, 7  ;;  %s204_s11 = scalar_lea.sflag [#allocation6], %s203_s29 }
  0x3f   : > { %s1296_s0 = scalar_lea.vmem [#allocation5], %s743_s12 }
  0x40   : > { %1035 = dma.done.wait (%p1239_p13), %s204_s11, 2048  }
  0x41   : > { %1037 = vsyncadd (%p1239_p13), %s204_s11, 4294965248  ;;  %s231_s21 = sand.u32 1, %s1048_s10   ;;  %p745_p8 = scmp.ne.s32.totalorder %s1080_s18, 0 }
  0x42   : > { %s744_s30 = sshll.u32 %s231_s21, 3 }
  0x43   : > { %s1305_s23 = scalar_lea.vmem [#allocation7], %s744_s30  ;;  %240 = sbr.rel (%p745_p8) target bundleno = 74 (0x4a), region = 40 }
  0x48   : > { %v1100_v0 = vmov 0.0  }
  0x49   : > { %241 = vst [vmem:[%s1305_s23] sm:$0xff] %v1100_v0 }
  0x4a PF: > { %v259_v1 = vld [vmem:[%s1296_s0 + $0x78] sm:$0xff]  ;;  %v258_v2 = vld [vmem:[%s1296_s0 + $0x70] sm:$0xff]  ;;  %v257_v3 = vld [vmem:[%s1296_s0 + $0x68] sm:$0xff]  ;;  %s747_s18 = sshll.u32 %s1084_s19, 3  ;;  %s617_s8 = sshll.u32 %s1305_s23, 4  ;;  %s618_s8 = int_to_ptr.vmem [resolvable:$true] %s617_s8 }
  0x4b   : > { %v1312_v4 = vand.u32 4294901760, %v259_v1  ;;  %v1314_v5 = vand.u32 4294901760, %v258_v2  ;;  %v1316_v6 = vand.u32 4294901760, %v257_v3  ;;  %v256_v7 = vld [vmem:[%s1296_s0 + $0x60] sm:$0xff]  ;;  %v255_v8 = vld [vmem:[%s1296_s0 + $0x58] sm:$0xff]  ;;  %v254_v9 = vld [vmem:[%s1296_s0 + $0x50] sm:$0xff]  ;;  %s615_s4 = scalar_lea.hbm %s1638_s2, %s747_s18 }
  0x4c   : > { %v1321_v10 = vand.u32 4294901760, %v256_v7  ;;  %v1323_v11 = vand.u32 4294901760, %v255_v8  ;;  %v1325_v12 = vand.u32 4294901760, %v254_v9  ;;  %v253_v13 = vld [vmem:[%s1296_s0 + $0x48] sm:$0xff]  ;;  %v252_v14 = vld [vmem:[%s1296_s0 + $0x40] sm:$0xff]  ;;  %v251_v19 = vld [vmem:[%s1296_s0 + $0x38] sm:$0xff] }
  0x4d   : > { %261 = vmatpush.msra.mxu0 %v1312_v4  ;;  %v1331_v15 = vsub.f32 %v259_v1, %v1312_v4  ;;  %v1334_v16 = vsub.f32 %v258_v2, %v1314_v5  ;;  %v1337_v17 = vsub.f32 %v257_v3, %v1316_v6  ;;  %v1339_v18 = vand.u32 4294901760, %v253_v13  ;;  %457 = vmatpush.msra.mxu3 %v1312_v4  ;;  %v250_v27 = vld [vmem:[%s1296_s0 + $0x30] sm:$0xff]  ;;  %v249_v37 = vld [vmem:[%s1296_s0 + $0x28] sm:$0xff]  ;;  %v248_v43 = vld [vmem:[%s1296_s0 + $0x20] sm:$0xff]  ;;  %s619_s25 = sshll.u32 %s615_s4, 4  ;;  %s604_s7 = scalar_lea.sflag [#allocation4], %s231_s21  ;;  %s620_s25 = int_to_ptr.hbm [resolvable:$true] %s619_s25 }
  0x4e   : > { %v1344_v20 = vsub.f32 %v256_v7, %v1321_v10  ;;  %v1347_v21 = vsub.f32 %v255_v8, %v1323_v11  ;;  %v1350_v22 = vsub.f32 %v254_v9, %v1325_v12  ;;  %v1356_v26 = vand.u32 4294901760, %v252_v14  ;;  %v247_v48 = vld [vmem:[%s1296_s0 + $0x18] sm:$0xff]  ;;  %v246_v56 = vld [vmem:[%s1296_s0 + $0x10] sm:$0xff]  ;;  %v245_v61 = vld [vmem:[%s1296_s0 + $0x8] sm:$0xff]  ;;  %s960_s19 = sshra.s32 %s620_s25, 4  ;;  %s966_s26 = scalar_lea.hbm %s1638_s2, 16  ;;  %s961_s19 = int_to_ptr.hbm [resolvable:$true] %s960_s19 }
  0x4f   : > { %263 = vmatpush.msra.mxu0 %v1314_v5  ;;  %v303_v23 = vand.u32 4294901760, %v1331_v15  ;;  %v309_v24 = vand.u32 4294901760, %v1334_v16  ;;  %v315_v25 = vand.u32 4294901760, %v1337_v17  ;;  %404 = vmatpush.msra.mxu2 %v1331_v15  ;;  %v1361_v29 = vand.u32 4294901760, %v251_v19  ;;  %v244_v2 = vld [vmem:[%s1296_s0] sm:$0xff]  ;;  %v243_v8 = vld [vmem:[%s197_s6] sm:$0xff]  ;;  %p967_p4 = scmp.lt.s32.totalorder %s961_s19, %s1638_s2 }
  0x50   : > { %v321_v28 = vand.u32 4294901760, %v1344_v20  ;;  %v1364_v30 = vsub.f32 %v253_v13, %v1339_v18  ;;  %459 = vmatpush.msra.mxu3 %v1314_v5  ;;  %v327_v34 = vand.u32 4294901760, %v1347_v21  ;;  %v333_v35 = vand.u32 4294901760, %v1350_v22  ;;  %s962_s15 = scalar_lea.hbm %s961_s19, 8 }
  0x51   : > { %265 = vmatpush.msra.mxu0 %v1316_v6  ;;  %v304_v31 = vsub.f32 %v1331_v15, %v303_v23  ;;  %v310_v32 = vsub.f32 %v1334_v16, %v309_v24  ;;  %v316_v33 = vsub.f32 %v1337_v17, %v315_v25  ;;  %407 = vmatpush.msra.mxu2 %v1334_v16  ;;  %v1380_v36 = vand.u32 4294901760, %v250_v27  ;;  %p963_p12 = scmp.ne.s32.totalorder %s961_s19, %s962_s15  ;;  %p968_p5 = scmp.lt.s32.totalorder %s966_s26, %s962_s15 }
  0x52   : > { %461 = vmatpush.msra.mxu3 %v1316_v6  ;;  %v322_v40 = vsub.f32 %v1344_v20, %v321_v28  ;;  %v1389_v41 = vsub.f32 %v252_v14, %v1356_v26  ;;  %v339_v42 = vand.u32 4294901760, %v1364_v30  ;;  %v328_v45 = vsub.f32 %v1347_v21, %v327_v34 }
  0x53   : > { %v305_v38 = vand.u32 4294901760, %v304_v31  ;;  %267 = vmatpush.msra.mxu0 %v1321_v10  ;;  %v311_v39 = vand.u32 4294901760, %v310_v32  ;;  %410 = vmatpush.msra.mxu2 %v1337_v17  ;;  %v317_v44 = vand.u32 4294901760, %v316_v33  ;;  %v1399_v46 = vand.u32 4294901760, %v249_v37  ;;  %p964_p13 = pnand %p963_p12, %p1255_p7  ;;  %p969_p6 = por %p968_p5, %p967_p4 }
  0x54   : > { %463 = vmatpush.msra.mxu3 %v1321_v10  ;;  %v1402_v47 = vsub.f32 %v251_v19, %v1361_v29  ;;  %v334_v49 = vsub.f32 %v1350_v22, %v333_v35  ;;  %v323_v50 = vand.u32 4294901760, %v322_v40  ;;  %v345_v51 = vand.u32 4294901760, %v1389_v41 }
  0x55   : > { %306 = vmatpush.msra.mxu1 %v305_v38  ;;  %269 = vmatpush.msra.mxu0 %v1323_v11  ;;  %v1412_v52 = vand.u32 4294901760, %v248_v43  ;;  %v1415_v53 = vsub.f32 %v250_v27, %v1380_v36  ;;  %v340_v54 = vsub.f32 %v1364_v30, %v339_v42  ;;  %v1420_v55 = vand.u32 4294901760, %v247_v48  ;;  %p965_p2 = pneg %p964_p13 }
  0x56   : > { %413 = vmatpush.msra.mxu2 %v1344_v20  ;;  %465 = vmatpush.msra.mxu3 %v1323_v11  ;;  %v329_v57 = vand.u32 4294901760, %v328_v45  ;;  %v351_v58 = vand.u32 4294901760, %v1402_v47  ;;  %v1428_v59 = vsub.f32 %v249_v37, %v1399_v46  ;;  %v335_v60 = vand.u32 4294901760, %v334_v49 }
  0x57   : > { %312 = vmatpush.msra.mxu1 %v311_v39  ;;  %271 = vmatpush.msra.mxu0 %v1325_v12  ;;  %v346_v62 = vsub.f32 %v1389_v41, %v345_v51  ;;  %v357_v63 = vand.u32 4294901760, %v1415_v53  ;;  %v1438_v0 = vand.u32 4294901760, %v246_v56  ;;  %v1441_v1 = vsub.f32 %v248_v43, %v1412_v52  ;;  %p970_p10 = pnand %p969_p6, %p965_p2 }
  0x58   : > { %416 = vmatpush.msra.mxu2 %v1347_v21  ;;  %467 = vmatpush.msra.mxu3 %v1325_v12  ;;  %v341_v3 = vand.u32 4294901760, %v340_v54  ;;  %v1445_v7 = vsub.f32 %v247_v48, %v1420_v55  ;;  %v352_v9 = vsub.f32 %v1402_v47, %v351_v58  ;;  %v363_v13 = vand.u32 4294901760, %v1428_v59 }
  0x59   : > { %318 = vmatpush.msra.mxu1 %v317_v44  ;;  %273 = vmatpush.msra.mxu0 %v1339_v18  ;;  %v1456_v14 = vand.u32 4294901760, %v245_v61  ;;  %v1458_v19 = vand.u32 4294901760, %v243_v8  ;;  %v1460_v27 = vand.u32 4294901760, %v244_v2  ;;  %v347_v31 = vand.u32 4294901760, %v346_v62 }
  0x5a   : > { %419 = vmatpush.msra.mxu2 %v1350_v22  ;;  %469 = vmatpush.msra.mxu3 %v1339_v18  ;;  %v358_v32 = vsub.f32 %v1415_v53, %v357_v63  ;;  %v369_v33 = vand.u32 4294901760, %v1441_v1  ;;  %v1470_v37 = vsub.f32 %v246_v56, %v1438_v0  ;;  %v375_v38 = vand.u32 4294901760, %v1445_v7 }
  0x5b   : > { %324 = vmatpush.msra.mxu1 %v323_v50  ;;  %275 = vmatpush.msra.mxu0 %v1356_v26  ;;  %v353_v39 = vand.u32 4294901760, %v352_v9  ;;  %v364_v40 = vsub.f32 %v1428_v59, %v363_v13  ;;  %v1480_v43 = vsub.f32 %v245_v61, %v1456_v14  ;;  %v293_v44 = vsub.f32 %v243_v8, %v1458_v19 }
  0x5c   : > { %422 = vmatpush.msra.mxu2 %v1364_v30  ;;  %471 = vmatpush.msra.mxu3 %v1356_v26  ;;  %v359_v45 = vand.u32 4294901760, %v358_v32  ;;  %v370_v48 = vsub.f32 %v1441_v1, %v369_v33  ;;  %v381_v49 = vand.u32 4294901760, %v1470_v37  ;;  %v1491_v50 = vsub.f32 %v244_v2, %v1460_v27 }
  0x5d   : > { %330 = vmatpush.msra.mxu1 %v329_v57  ;;  %277 = vmatpush.msra.mxu0 %v1361_v29  ;;  %v365_v54 = vand.u32 4294901760, %v364_v40  ;;  %v376_v56 = vsub.f32 %v1445_v7, %v375_v38  ;;  %v387_v57 = vand.u32 4294901760, %v1480_v43 }
  0x5e   : > { %425 = vmatpush.msra.mxu2 %v1389_v41  ;;  %473 = vmatpush.msra.mxu3 %v1361_v29  ;;  %v371_v61 = vand.u32 4294901760, %v370_v48  ;;  %v382_v62 = vsub.f32 %v1470_v37, %v381_v49  ;;  %v393_v2 = vand.u32 4294901760, %v1491_v50 }
  0x5f   : > { %336 = vmatpush.msra.mxu1 %v335_v60  ;;  %279 = vmatpush.msra.mxu0 %v1380_v36  ;;  %v294_v60 = vand.u32 4294901760, %v293_v44  ;;  %v388_v8 = vsub.f32 %v1480_v43, %v387_v57 }
  0x60   : > { %428 = vmatpush.msra.mxu2 %v1402_v47  ;;  %475 = vmatpush.msra.mxu3 %v1380_v36  ;;  %v394_v32 = vsub.f32 %v1491_v50, %v393_v2 }
  0x61   : > { %342 = vmatpush.msra.mxu1 %v341_v3  ;;  %281 = vmatpush.msra.mxu0 %v1399_v46  ;;  %v377_v3 = vand.u32 4294901760, %v376_v56  ;;  %v295_v9 = vsub.f32 %v293_v44, %v294_v60 }
  0x62   : > { %431 = vmatpush.msra.mxu2 %v1415_v53  ;;  %477 = vmatpush.msra.mxu3 %v1399_v46 }
  0x63   : > { %348 = vmatpush.msra.mxu1 %v347_v31  ;;  %283 = vmatpush.msra.mxu0 %v1412_v52  ;;  %v383_v31 = vand.u32 4294901760, %v382_v62  ;;  %v296_v40 = vand.u32 4294901760, %v295_v9 }
  0x64   : > { %434 = vmatpush.msra.mxu2 %v1428_v59  ;;  %479 = vmatpush.msra.mxu3 %v1412_v52 }
  0x65   : > { %354 = vmatpush.msra.mxu1 %v353_v39  ;;  %285 = vmatpush.msra.mxu0 %v1420_v55  ;;  %v389_v39 = vand.u32 4294901760, %v388_v8 }
  0x66   : > { %437 = vmatpush.msra.mxu2 %v1441_v1  ;;  %481 = vmatpush.msra.mxu3 %v1420_v55 }
  0x67   : > { %360 = vmatpush.msra.mxu1 %v359_v45  ;;  %287 = vmatpush.msra.mxu0 %v1438_v0  ;;  %v395_v45 = vand.u32 4294901760, %v394_v32 }
  0x68   : > { %440 = vmatpush.msra.mxu2 %v1445_v7  ;;  %483 = vmatpush.msra.mxu3 %v1438_v0 }
  0x69   : > { %366 = vmatpush.msra.mxu1 %v365_v54  ;;  %289 = vmatpush.msra.mxu0 %v1456_v14 }
  0x6a   : > { %443 = vmatpush.msra.mxu2 %v1470_v37  ;;  %485 = vmatpush.msra.mxu3 %v1456_v14 }
  0x6b   : > { %372 = vmatpush.msra.mxu1 %v371_v61  ;;  %291 = vmatpush.msra.mxu0 %v1460_v27 }
  0x6c   : > { %446 = vmatpush.msra.mxu2 %v1480_v43  ;;  %487 = vmatpush.msra.mxu3 %v1460_v27 }
  0x6d   : > { %498 = vmatpush.msrb.mxu0 %v303_v23  ;;  %378 = vmatpush.msra.mxu1 %v377_v3 }
  0x6e   : > { %449 = vmatpush.msra.mxu2 %v1491_v50  ;;  %491 = vmatmul.f32.vlgmr.msra.gmra.mxu3 %v294_v60 }
  0x6f   : > { %502 = vmatpush.msrb.mxu0 %v309_v24  ;;  %384 = vmatpush.msra.mxu1 %v383_v31 }
  0x70   : > { %452 = vmatmul.f32.vlgmr.msra.gmra.mxu2 %v293_v44  ;;  %297 = vmatmul.f32.vlgmr.msra.gmra.mxu0 %v296_v40 }
  0x71   : > { %506 = vmatpush.msrb.mxu0 %v315_v25  ;;  %390 = vmatpush.msra.mxu1 %v389_v39 }
  0x73   : > { %510 = vmatpush.msrb.mxu0 %v321_v28  ;;  %396 = vmatpush.msra.mxu1 %v395_v45 }
  0x74   : > { %398 = vmatmul.f32.vlgmr.msra.gmra.mxu1 %v1458_v19 }
  0x75   : > { %565 = vmatpush.msrb.mxu1 %v1312_v4  ;;  %514 = vmatpush.msrb.mxu0 %v327_v34 }
  0x77   : > { %567 = vmatpush.msrb.mxu1 %v1314_v5  ;;  %518 = vmatpush.msrb.mxu0 %v333_v35 }
  0x79   : > { %569 = vmatpush.msrb.mxu1 %v1316_v6  ;;  %522 = vmatpush.msrb.mxu0 %v339_v42 }
  0x7b   : > { %571 = vmatpush.msrb.mxu1 %v1321_v10  ;;  %526 = vmatpush.msrb.mxu0 %v345_v51 }
  0x7d   : > { %573 = vmatpush.msrb.mxu1 %v1323_v11  ;;  %530 = vmatpush.msrb.mxu0 %v351_v58 }
  0x7f   : > { %575 = vmatpush.msrb.mxu1 %v1325_v12  ;;  %534 = vmatpush.msrb.mxu0 %v357_v63 }
  0x81   : > { %577 = vmatpush.msrb.mxu1 %v1339_v18  ;;  %538 = vmatpush.msrb.mxu0 %v363_v13  ;;  %v242_v18 = vld [vmem:[%s1305_s23] sm:$0xff] }
  0x83   : > { %579 = vmatpush.msrb.mxu1 %v1356_v26  ;;  %542 = vmatpush.msrb.mxu0 %v369_v33 }
  0x85   : > { %581 = vmatpush.msrb.mxu1 %v1361_v29  ;;  %546 = vmatpush.msrb.mxu0 %v375_v38 }
  0x87   : > { %583 = vmatpush.msrb.mxu1 %v1380_v36  ;;  %550 = vmatpush.msrb.mxu0 %v381_v49 }
  0x89   : > { %585 = vmatpush.msrb.mxu1 %v1399_v46  ;;  %554 = vmatpush.msrb.mxu0 %v387_v57 }
  0x8b   : > { %587 = vmatpush.msrb.mxu1 %v1412_v52  ;;  %558 = vmatpush.msrb.mxu0 %v393_v2 }
  0x8c   : > { %560 = vmatmul.f32.vlgmr.msrb.gmra.mxu0 %v1458_v19 }
  0x8d   : > { %589 = vmatpush.msrb.mxu1 %v1420_v55 }
  0x8f   : > { %591 = vmatpush.msrb.mxu1 %v1438_v0 }
  0x91   : > { %593 = vmatpush.msrb.mxu1 %v1456_v14 }
  0x93   : > { %595 = vmatpush.msrb.mxu1 %v1460_v27 }
  0x94   : > { %597 = vmatmul.f32.vlgmr.msrb.gmra.mxu1 %v1458_v19 }
  0xed   : > { %v298_v5 = vpop.f32.mrf.mxu0 }
  0xf1   : > { %v399_v4 = vpop.f32.mrf.mxu1  ;;  %v492_v12 = vpop.f32.mrf.mxu3 }
  0xf2   : > { %v400_v6 = vadd.f32 %v399_v4, %v298_v5 }
  0xf3   : > { %v453_v10 = vpop.f32.mrf.mxu2 }
  0xf4   : > { %v454_v11 = vadd.f32 %v453_v10, %v400_v6 }
  0xf6   : > { %v493_v15 = vadd.f32 %v492_v12, %v454_v11 }
 0x109   : > { %v561_v16 = vpop.f32.mrf.mxu0 }
 0x10a   : > { %v562_v17 = vadd.f32 %v561_v16, %v493_v15 }
 0x111   : > { %v598_v20 = vpop.f32.mrf.mxu1 }
 0x112   : > { %v599_v21 = vadd.f32 %v598_v20, %v562_v17 }
 0x114   : > { %v601_v22 = vadd.f32 %v599_v21, %v242_v18 }
 0x116   : > { %602 = vst [vmem:[%s1305_s23] sm:$0xff] %v601_v22 }
 0x117   : > { %973 = shalt.err (!%p970_p10)
}
 0x118   : > { %756 = dma.vmem_to_hbm [thread:$0]  (%p1255_p7), %s618_s8, 128, %s620_s25, %s604_s7  }
 0x119 PF: > { %p770_p11 = scmp.ge.s32.totalorder %s1096_s22, 2  ;;  %s631_s12 = sand.u32 1, %s1044_s9  }
 0x11a   : > { %s632_s11 = scalar_lea.sflag [#allocation4], %s631_s12 }
 0x11b   : > { %p766_p0 = pnand %p770_p11, %p1260_p9 }
 0x11d   : > { %p767_p1 = pneg %p766_p0 }
 0x11f   : > { %1039 = dma.done.wait (%p767_p1), %s632_s11, 128  }
 0x120   : > { %1041 = vsyncadd (%p767_p1), %s632_s11, 4294967168  ;;  %s21_s22 = sadd.s32 1, %s1096_s22   ;;  %s1667_s27 = sld [smem:[#allocation11_spill]] }
 0x121   : > { %p1589_p3 = scmp.ge.s32.totalorder %s21_s22, 14   ;;  %s1668_s11 = sld [smem:[#allocation18_spill]] }
 0x122   : > { %s1669_s21 = sld [smem:[#allocation16_spill]]  ;;  %s1675_s9 = smov %s1048_s10 }
 0x123   : > { %s1670_s30 = sld [smem:[#allocation12_spill]]  ;;  %s1677_s12 = smov %s1060_s13 }
 0x124   : > { %s1671_s17 = sld [smem:[#allocation17_spill]]  ;;  %s1678_s13 = smov %s1064_s14 }
 0x125   : > { %s1672_s19 = sld [smem:[#allocation13_spill]]  ;;  %s1680_s15 = smov %s1072_s16 }
 0x126   : > { %s1673_s23 = sld [smem:[#allocation14_spill]]  ;;  %s1676_s10 = smov %s1667_s27 }
 0x127   : > { %s1674_s24 = sld [smem:[#allocation15_spill]]  ;;  %s1682_s18 = smov %s1088_s20 }
 0x128   : > { %s1679_s14 = smov %s1669_s21 }
 0x129   : > { %s1681_s16 = smov %s1670_s30  ;;  %20 = sbr.rel (!%p1589_p3) target bundleno = 14 (0xe), region = 90 }
 0x12c   : > { %s1683_s20 = smov %s1673_s23 }
 0x12d   : > { %s1684_s21 = smov %s1674_s24 }
 0x12e   :  { %638 = vsyncpa [#allocation3], 1 }
 0x12f   :  { %640 = vsyncpa [#allocation3 + $0x1], 1 }
 0x130   :  { %641 = vsyncpa [#allocation6], 1 }
 0x131   :  { %643 = vsyncpa [#allocation6 + $0x1], 1 }
 0x132   :  { %644 = vsyncpa [#allocation4], 1 }
 0x133   :  { %646 = vsyncpa [#allocation4 + $0x1], 1 }

</bundles_post_ra>
